<compile_context>
chip_gen: v6e
topology: v6e:2x2x1
jax: 0.10.0
libtpu: 0.0.40
codegen_flags: <defaults>
</compile_context>

<pallas_src>
import jax
import jax.numpy as jnp
from jax.experimental import pallas as pl
from jax.experimental.pallas import tpu as pltpu


def _round_up(x, m):
    return ((x + m - 1) // m) * m


def _conv1x1_hardsig_kernel(x_ref, w_ref, b_ref, o_ref):
    # x_ref : (B, Cin, T)   f32  VMEM   (T = spatial lane tile)
    # w_ref : (Cout, Cin)   f32  VMEM   (weights pre-scaled by 1/6)
    # b_ref : (Cout, 1)     f32  VMEM   ((bias + 3) / 6, pre-folded)
    # o_ref : (B, Cout, T)  f32  VMEM
    x = x_ref[...]
    w = w_ref[...]
    cin = x.shape[1]

    y = b_ref[...][None, :, :]                      # (1, Cout, 1)
    for c in range(cin):                            # unrolled VPU contraction (Cin=3)
        y = y + w[:, c][None, :, None] * x[:, c:c + 1, :]   # (1,Cout,1)*(B,1,T)

    o_ref[...] = jnp.clip(y, 0.0, 1.0).astype(o_ref.dtype)


def model_forward(x_nchw, weight, bias, *, max_tile=16384, target_step_lanes=8192):
    """x_nchw: (N, Cin, H, W); weight: (Cout, Cin, 1, 1); bias: (Cout,).
    Returns (N, Cout, H+2, W+2), identical to the PyTorch module."""
    N, Cin, H, W = x_nchw.shape
    Cout = weight.shape[0]
    Hp, Wp = H + 2, W + 2
    S = Hp * Wp
    LANE = 128

    # Zero-pad the input spatially: the 1x1 conv over the padded input IS the
    # final padded output, so no border epilogue is needed after the kernel.
    x_pad = jnp.pad(x_nchw.astype(jnp.float32), ((0, 0), (0, 0), (1, 1), (1, 1)))
    x_flat = x_pad.reshape(N, Cin, S)

    # Fold hardsigmoid scaling into the (tiny) parameters:
    #   clip(w.x + b + 3, 0, 6)/6 == clip((w/6).x + (b+3)/6, 0, 1)
    w = (weight.reshape(Cout, Cin) / 6.0).astype(jnp.float32)
    b = ((bias.astype(jnp.float32) + 3.0) / 6.0).reshape(Cout, 1)

    # ---- spatial tile (lane dim): large, 128-aligned, VMEM-bounded ----
    t = min(max_tile, _round_up(S, LANE))
    if N == 1:
        # ensure >= 2 parallel grid steps so both v7x TensorCores get work
        t = min(t, _round_up(pl.cdiv(S, 2), LANE))
    if t >= S:
        t = S                                   # single full-width block (always legal)
    grid_s = pl.cdiv(S, t)

    # ---- batch grouping: amortize per-step overhead for small images ----
    if grid_s == 1 and N > 1:
        b_tile = max(1, min(N, target_step_lanes // max(S, 1)))
        while N % b_tile != 0:                  # keep batch blocks exactly divisible
            b_tile -= 1
    else:
        b_tile = 1
    grid_b = pl.cdiv(N, b_tile)

    out_flat = pl.pallas_call(
        _conv1x1_hardsig_kernel,
        out_shape=jax.ShapeDtypeStruct((N, Cout, S), jnp.float32),
        grid=(grid_b, grid_s),
        in_specs=[
            pl.BlockSpec((b_tile, Cin, t), lambda bi, si: (bi, 0, si)),
            pl.BlockSpec((Cout, Cin), lambda bi, si: (0, 0)),
            pl.BlockSpec((Cout, 1), lambda bi, si: (0, 0)),
        ],
        out_specs=pl.BlockSpec((b_tile, Cout, t), lambda bi, si: (bi, 0, si)),
        compiler_params=pltpu.CompilerParams(
            dimension_semantics=("parallel", "parallel")),
    )(x_flat, w, b)

    return out_flat.reshape(N, Cout, Hp, Wp)


def _reference(x_nchw, weight, bias):
    # pure-JAX reference for sanity checking
    N, C, H, W = x_nchw.shape
    Cout = weight.shape[0]
    x_pad = jnp.pad(x_nchw, ((0, 0), (0, 0), (1, 1), (1, 1)))
    w = weight.reshape(Cout, C)
    v1 = jnp.einsum("nchw,oc->nohw", x_pad, w) + bias.reshape(1, Cout, 1, 1)
    return jnp.clip(v1 + 3.0, 0.0, 6.0) / 6.0


if __name__ == "__main__":
    key = jax.random.PRNGKey(0)
    kx1, kx2, kw, kb = jax.random.split(key, 4)

    Cin, Cout = 3, 8
    fan_in = Cin * 1 * 1
    bound = 1.0 / (fan_in ** 0.5)
    weight = jax.random.uniform(kw, (Cout, Cin, 1, 1), jnp.float32, -bound, bound)
    bias = jax.random.uniform(kb, (Cout,), jnp.float32, -bound, bound)

    # (a) small batched case -> batch-grouped single-block path
    xa = jax.random.normal(kx1, (2, Cin, 16, 16), dtype=jnp.float32)
    # (b) module-spec-like case (N=1, 64x64) -> two parallel lane tiles, ragged tail
    xb = jax.random.normal(kx2, (1, Cin, 64, 64), dtype=jnp.float32)

    for x in (xa, xb):
        out = jax.block_until_ready(model_forward(x, weight, bias))
        ref = _reference(x, weight, bias)
        N, _, H, W = x.shape
        assert out.shape == (N, Cout, H + 2, W + 2)
        assert jnp.allclose(out, ref, atol=1e-5, rtol=1e-5), \
            float(jnp.max(jnp.abs(out - ref)))

    print("KERNEL_OK")
</pallas_src>

<mosaic_0001>
module attributes {stable_mosaic.version = 11 : i64} {
  func.func @_conv1x1_hardsig_kernel(%arg0: i32, %arg1: i32, %arg2: memref<2x3x324xf32, #tpu.memory_space<vmem>>, %arg3: memref<8x3xf32, #tpu.memory_space<vmem>>, %arg4: memref<8x1xf32, #tpu.memory_space<vmem>>, %arg5: memref<2x8x324xf32, #tpu.memory_space<vmem>>) attributes {dimension_semantics = [#tpu.dimension_semantics<parallel>, #tpu.dimension_semantics<parallel>], iteration_bounds = array<i64: 1, 1>, scalar_prefetch = 0 : i64, scratch_operands = 0 : i64, tpu.core_type = #tpu.core_type<tc>, window_params = [{transform_indices = @transform_0, window_bounds = array<i64: 2, 3, 324>}, {pipeline_mode = #tpu.pipeline_mode<synchronous>, transform_indices = @transform_1, window_bounds = array<i64: 8, 3>}, {pipeline_mode = #tpu.pipeline_mode<synchronous>, transform_indices = @transform_2, window_bounds = array<i64: 8, 1>}, {transform_indices = @transform_3, window_bounds = array<i64: 2, 8, 324>}]} {
    %c0 = arith.constant 0 : index
    %c0_0 = arith.constant 0 : index
    %c0_1 = arith.constant 0 : index
    %0 = vector.load %arg2[%c0, %c0_0, %c0_1] : memref<2x3x324xf32, #tpu.memory_space<vmem>>, vector<2x3x324xf32>
    %c0_2 = arith.constant 0 : index
    %c0_3 = arith.constant 0 : index
    %1 = vector.load %arg3[%c0_2, %c0_3] : memref<8x3xf32, #tpu.memory_space<vmem>>, vector<8x3xf32>
    %c0_4 = arith.constant 0 : index
    %c0_5 = arith.constant 0 : index
    %2 = vector.load %arg4[%c0_4, %c0_5] : memref<8x1xf32, #tpu.memory_space<vmem>>, vector<8x1xf32>
    %3 = vector.shape_cast %2 : vector<8x1xf32> to vector<1x8x1xf32>
    %4 = vector.extract_strided_slice %1 {offsets = [0, 0], sizes = [8, 1], strides = [1, 1]} : vector<8x3xf32> to vector<8x1xf32>
    %5 = vector.shape_cast %4 : vector<8x1xf32> to vector<8xf32>
    %6 = vector.shape_cast %5 : vector<8xf32> to vector<1x8x1xf32>
    %7 = vector.extract_strided_slice %0 {offsets = [0, 0, 0], sizes = [2, 1, 324], strides = [1, 1, 1]} : vector<2x3x324xf32> to vector<2x1x324xf32>
    %8 = vector.broadcast %6 : vector<1x8x1xf32> to vector<2x8x324xf32>
    %9 = vector.broadcast %7 : vector<2x1x324xf32> to vector<2x8x324xf32>
    %10 = arith.mulf %8, %9 : vector<2x8x324xf32>
    %11 = vector.broadcast %3 : vector<1x8x1xf32> to vector<2x8x324xf32>
    %12 = arith.addf %11, %10 : vector<2x8x324xf32>
    %13 = vector.extract_strided_slice %1 {offsets = [0, 1], sizes = [8, 1], strides = [1, 1]} : vector<8x3xf32> to vector<8x1xf32>
    %14 = vector.shape_cast %13 : vector<8x1xf32> to vector<8xf32>
    %15 = vector.shape_cast %14 : vector<8xf32> to vector<1x8x1xf32>
    %16 = vector.extract_strided_slice %0 {offsets = [0, 1, 0], sizes = [2, 1, 324], strides = [1, 1, 1]} : vector<2x3x324xf32> to vector<2x1x324xf32>
    %17 = vector.broadcast %15 : vector<1x8x1xf32> to vector<2x8x324xf32>
    %18 = vector.broadcast %16 : vector<2x1x324xf32> to vector<2x8x324xf32>
    %19 = arith.mulf %17, %18 : vector<2x8x324xf32>
    %20 = arith.addf %12, %19 : vector<2x8x324xf32>
    %21 = vector.extract_strided_slice %1 {offsets = [0, 2], sizes = [8, 1], strides = [1, 1]} : vector<8x3xf32> to vector<8x1xf32>
    %22 = vector.shape_cast %21 : vector<8x1xf32> to vector<8xf32>
    %23 = vector.shape_cast %22 : vector<8xf32> to vector<1x8x1xf32>
    %24 = vector.extract_strided_slice %0 {offsets = [0, 2, 0], sizes = [2, 1, 324], strides = [1, 1, 1]} : vector<2x3x324xf32> to vector<2x1x324xf32>
    %25 = vector.broadcast %23 : vector<1x8x1xf32> to vector<2x8x324xf32>
    %26 = vector.broadcast %24 : vector<2x1x324xf32> to vector<2x8x324xf32>
    %27 = arith.mulf %25, %26 : vector<2x8x324xf32>
    %28 = arith.addf %20, %27 : vector<2x8x324xf32>
    %cst = arith.constant 0.000000e+00 : f32
    %cst_6 = arith.constant 1.000000e+00 : f32
    %29 = vector.broadcast %cst : f32 to vector<2x8x324xf32>
    %30 = arith.maximumf %29, %28 : vector<2x8x324xf32>
    %31 = vector.broadcast %cst_6 : f32 to vector<2x8x324xf32>
    %32 = arith.minimumf %31, %30 : vector<2x8x324xf32>
    %c0_7 = arith.constant 0 : index
    %c0_8 = arith.constant 0 : index
    %c0_9 = arith.constant 0 : index
    %33 = vector.load %arg5[%c0_7, %c0_8, %c0_9] : memref<2x8x324xf32, #tpu.memory_space<vmem>>, vector<2x8x324xf32>
    tpu.vector_store %arg5[%c0_7, %c0_8, %c0_9], %32 {strides = array<i32>} : memref<2x8x324xf32, #tpu.memory_space<vmem>>, vector<2x8x324xf32>,
    return
  }
  func.func @transform_0(%arg0: i32, %arg1: i32) -> (i32, i32, i32) {
    %c0_i32 = arith.constant 0 : i32
    %c0_i32_0 = arith.constant 0 : i32
    return %arg0, %c0_i32, %arg1 : i32, i32, i32
  }
  func.func @transform_1(%arg0: i32, %arg1: i32) -> (i32, i32) {
    %c0_i32 = arith.constant 0 : i32
    %c0_i32_0 = arith.constant 0 : i32
    %c0_i32_1 = arith.constant 0 : i32
    return %c0_i32, %c0_i32_0 : i32, i32
  }
  func.func @transform_2(%arg0: i32, %arg1: i32) -> (i32, i32) {
    %c0_i32 = arith.constant 0 : i32
    %c0_i32_0 = arith.constant 0 : i32
    %c0_i32_1 = arith.constant 0 : i32
    return %c0_i32, %c0_i32_0 : i32, i32
  }
  func.func @transform_3(%arg0: i32, %arg1: i32) -> (i32, i32, i32) {
    %c0_i32 = arith.constant 0 : i32
    %c0_i32_0 = arith.constant 0 : i32
    return %arg0, %c0_i32, %arg1 : i32, i32, i32
  }
}

</mosaic_0001>

<bundles_post_ra>
// kernel: tpu_custom_call.1
= control target key start
LH: loop header
LB: loop body
LE: loop exit
PB: predicated region body
PF: predicated region fallthrough
CT: control target
= control target key end

     0   :  { %v308_v1 = vmov 0   ;;  %v309_v2 = vmov 1   ;;  %s369_s0 = inlined_call_operand.vmem [shape: f32[2,3,324], index: 0, kind: input, shape index: {}]   ;;  %s370_s1 = inlined_call_operand.vmem [shape: f32[8,3], index: 1, kind: input, shape index: {}]   ;;  %s371_s2 = inlined_call_operand.vmem [shape: f32[8,1], index: 2, kind: input, shape index: {}]   ;;  %s372_s3 = inlined_call_operand.hbm [shape: f32[2,8,324], index: 3, kind: output, shape index: {}]  }
   0x1   :  { %v19_v0 = vld [vmem:[%s370_s1] sm:$0xff]  ;;  %282 = vset.pattern.permute.xlu0 %v308_v1  ;;  %283 = vset.pattern.permute.xlu1 %v309_v2 }
   0x2   :  { %23 = vperm.xlu0 %282, %v19_v0   ;;  %102 = vperm.xlu1 %283, %v19_v0  }
   0x3   :  { %8 = vsyncpa [#allocation3], 0  ;;  %v20_v3 = vld [vmem:[%s371_s2] sm:$0xff]  ;;  %v310_v4 = vmov 2   ;;  %v30_v5 = vlaneseq  ;;  %v16_v11 = vld [vmem:[%s369_s0 + $0x8] sm:$0x7] }
   0x4   :  { %v15_v9 = vld [vmem:[%s369_s0] sm:$0x77]  ;;  %v17_v12 = vld [vmem:[%s369_s0 + $0xc] sm:$0x77]  ;;  %v18_v14 = vld [vmem:[%s369_s0 + $0x14] sm:$0x7] }
   0x5   :  { %v31_v6 = vshrl.u32 %v30_v5, 7  ;;  %s311_s0 = smov [#allocation2]   ;;  %vm255_vm0 = vcmask 556032  }
   0x6   :  { %92 = vperm.xlu0 %282, %v20_v3   ;;  %284 = vset.pattern.permute.xlu1 %v310_v4  ;;  %s265_s22 = sshll.u32 %s311_s0, 4  ;;  %s266_s22 = int_to_ptr.vmem [resolvable:$true] %s265_s22 }
   0x7   :  { %172 = vperm.xlu1 %284, %v19_v0   ;;  %v107_v7 = vsub.s32 1, %v31_v6  ;;  %v111_v8 = vsub.s32 5, %v31_v6  ;;  %v32_v10 = vsub.s32 0, %v31_v6  ;;  %v36_v16 = vsub.s32 4, %v31_v6  ;;  %s286_s23 = scalar_lea.vmem %s266_s22, 768  ;;  %p291_p1 = scmp.lt.s32.totalorder %s266_s22, %s266_s22 }
   0x8   :  { %v352_v17 = vsub.s32 2, %v31_v6  ;;  %v181_v18 = vsub.s32 6, %v31_v6  ;;  %p287_p0 = scmp.ne.s32.totalorder %s266_s22, %s286_s23  ;;  %p292_p2 = scmp.lt.s32.totalorder %s286_s23, %s286_s23 }
   0x9   :  { %v108_v13 = vrot.slane %v15_v9, %v107_v7  ;;  %v112_v15 = vrot.slane %v15_v9, %v111_v8  ;;  %v116_v19 = vrot.slane %v16_v11, %v107_v7  ;;  %v120_v20 = vrot.slane %v17_v12, %v107_v7 }
   0xa   :  { %285 = vset.pattern.permute.xlu0 %v310_v4  ;;  %v124_v21 = vrot.slane %v17_v12, %v111_v8  ;;  %v128_v22 = vrot.slane %v18_v14, %v107_v7  ;;  %v33_v24 = vrot.slane %v15_v9, %v32_v10  ;;  %v37_v26 = vrot.slane %v15_v9, %v36_v16  ;;  %p293_p3 = por %p292_p2, %p291_p1 }
   0xb   :  { %v138_v23 = vrot.slane %v108_v13, %v107_v7  ;;  %v142_v25 = vrot.slane %v112_v15, %v107_v7  ;;  %v41_v27 = vrot.slane %v16_v11, %v32_v10  ;;  %v45_v28 = vrot.slane %v17_v12, %v32_v10 }
   0xc   :  { %v49_v29 = vrot.slane %v17_v12, %v36_v16  ;;  %v53_v30 = vrot.slane %v18_v14, %v32_v10  ;;  %v178_v31 = vrot.slane %v15_v9, %v352_v17  ;;  %v182_v32 = vrot.slane %v15_v9, %v181_v18  ;;  %p294_p4 = pnand %p293_p3, %p287_p0 }
   0xd   :  { %v186_v33 = vrot.slane %v16_v11, %v352_v17  ;;  %v190_v34 = vrot.slane %v17_v12, %v352_v17  ;;  %v194_v35 = vrot.slane %v17_v12, %v181_v18  ;;  %v198_v36 = vrot.slane %v18_v14, %v352_v17 }
   0xe   :  { %v146_v37 = vrot.slane %v116_v19, %v107_v7  ;;  %v150_v38 = vrot.slane %v120_v20, %v107_v7  ;;  %v154_v39 = vrot.slane %v124_v21, %v107_v7  ;;  %v158_v40 = vrot.slane %v128_v22, %v107_v7 }
   0xf   :  { %v63_v41 = vrot.slane %v33_v24, %v32_v10  ;;  %v67_v42 = vrot.slane %v37_v26, %v32_v10  ;;  %v71_v43 = vrot.slane %v41_v27, %v32_v10  ;;  %v75_v44 = vrot.slane %v45_v28, %v32_v10 }
  0x10   :  { %v79_v47 = vrot.slane %v49_v29, %v32_v10  ;;  %v83_v48 = vrot.slane %v53_v30, %v32_v10  ;;  %v208_v49 = vrot.slane %v178_v31, %v352_v17  ;;  %v212_v50 = vrot.slane %v182_v32, %v352_v17 }
  0x11   :  { %v216_v51 = vrot.slane %v186_v33, %v352_v17  ;;  %v220_v52 = vrot.slane %v190_v34, %v352_v17  ;;  %v224_v53 = vrot.slane %v194_v35, %v352_v17  ;;  %v228_v54 = vrot.slane %v198_v36, %v352_v17 }
  0x7d   :  { %v24_v45 = vpop.permute.xlu0 %23  ;;  %v103_v46 = vpop.permute.xlu1 %102 }
  0x7e   :  { %v159_v55 = vmul.f32 %v138_v23, %v103_v46  ;;  %v160_v56 = vmul.f32 %v142_v25, %v103_v46  ;;  %v161_v57 = vmul.f32 %v146_v37, %v103_v46  ;;  %v162_v58 = vmul.f32 %v150_v38, %v103_v46 }
  0x7f   :  { %v84_v59 = vmul.f32 %v63_v41, %v24_v45  ;;  %v85_v60 = vmul.f32 %v67_v42, %v24_v45  ;;  %v86_v61 = vmul.f32 %v71_v43, %v24_v45  ;;  %v87_v62 = vmul.f32 %v75_v44, %v24_v45 }
  0x80   :  { %v163_v63 = vmul.f32 %v154_v39, %v103_v46  ;;  %v164_v0 = vmul.f32 %v158_v40, %v103_v46  ;;  %v88_v2 = vmul.f32 %v79_v47, %v24_v45  ;;  %v89_v3 = vmul.f32 %v83_v48, %v24_v45 }
  0x81   :  { %v93_v1 = vpop.permute.xlu0 %92 }
  0x82   :  { %v95_v4 = vadd.f32 %v93_v1, %v84_v59  ;;  %v96_v5 = vadd.f32 %v93_v1, %v85_v60  ;;  %v97_v6 = vadd.f32 %v93_v1, %v86_v61  ;;  %v98_v7 = vadd.f32 %v93_v1, %v87_v62  ;;  %v173_v8 = vpop.permute.xlu1 %172 }
  0x83   :  { %v99_v9 = vadd.f32 %v93_v1, %v88_v2  ;;  %v100_v10 = vadd.f32 %v93_v1, %v89_v3  ;;  %v229_v11 = vmul.f32 %v208_v49, %v173_v8  ;;  %v230_v12 = vmul.f32 %v212_v50, %v173_v8 }
  0x84   :  { %v165_v13 = vadd.f32 %v159_v55, %v95_v4  ;;  %v166_v14 = vadd.f32 %v160_v56, %v96_v5  ;;  %v167_v15 = vadd.f32 %v161_v57, %v97_v6  ;;  %v168_v16 = vadd.f32 %v162_v58, %v98_v7 }
  0x85   :  { %v169_v17 = vadd.f32 %v163_v63, %v99_v9  ;;  %v170_v18 = vadd.f32 %v164_v0, %v100_v10  ;;  %v231_v19 = vmul.f32 %v216_v51, %v173_v8  ;;  %v232_v20 = vmul.f32 %v220_v52, %v173_v8 }
  0x86   :  { %v233_v21 = vmul.f32 %v224_v53, %v173_v8  ;;  %v234_v22 = vmul.f32 %v228_v54, %v173_v8  ;;  %v235_v23 = vadd.f32 %v229_v11, %v165_v13  ;;  %v236_v24 = vadd.f32 %v230_v12, %v166_v14 }
  0x87   :  { %v237_v25 = vadd.f32 %v231_v19, %v167_v15  ;;  %v238_v26 = vadd.f32 %v232_v20, %v168_v16 }
  0x88   :  { %v239_v27 = vadd.f32 %v233_v21, %v169_v17  ;;  %v240_v28 = vadd.f32 %v234_v22, %v170_v18  ;;  %v241_v29 = vmax.f32 %v235_v23, 0.0  ;;  %v242_v30 = vmax.f32 %v236_v24, 0.0 }
  0x89   :  { %v243_v31 = vmax.f32 %v237_v25, 0.0  ;;  %v244_v32 = vmax.f32 %v238_v26, 0.0 }
  0x8a   :  { %v245_v33 = vmax.f32 %v239_v27, 0.0  ;;  %v246_v34 = vmax.f32 %v240_v28, 0.0  ;;  %v247_v35 = vmin.f32 %v241_v29, 1.0  ;;  %v248_v36 = vmin.f32 %v242_v30, 1.0 }
  0x8b   :  { %v249_v37 = vmin.f32 %v243_v31, 1.0  ;;  %v250_v38 = vmin.f32 %v244_v32, 1.0 }
  0x8c   :  { %v251_v39 = vmin.f32 %v245_v33, 1.0  ;;  %v252_v40 = vmin.f32 %v246_v34, 1.0  ;;  %253 = vst [vmem:[#allocation2] sm:$0xff] %v247_v35  ;;  %254 = vst [vmem:[#allocation2 + $0x8] sm:$0xff] %v248_v36 }
  0x8d   :  { %256 = vst.msk [vmem:[#allocation2 + $0x10] sm:$0xff] %vm255_vm0, %v249_v37  ;;  %257 = vst [vmem:[#allocation2 + $0x18] sm:$0xff] %v250_v38 }
  0x8e   :  { %258 = vst [vmem:[#allocation2 + $0x20] sm:$0xff] %v251_v39  ;;  %259 = vst.msk [vmem:[#allocation2 + $0x28] sm:$0xff] %vm255_vm0, %v252_v40 }
  0x8f   :  { %297 = shalt.err (!%p294_p4)
}
  0x90   :  { %s312_s24 = smov 384   ;;  %s313_s25 = smov 24  }
  0x91   :  { %271 = dma.vmem_to_hbm [thread:$0]  %s266_s22, 768, %s372_s3, [#allocation3], %s312_s24, %s312_s24, %s313_s25  }
  0x92   :  { %306 = dma.done.wait [#allocation3], 768  }
  0x93   :  { %307 = vsyncadd [#allocation3], 4294966528 }
  0x94   :  { %275 = vsyncpa [#allocation3], 1 }

</bundles_post_ra>
